<compile_context>
chip_gen: v5e
topology: v5e:2x2
jax: 0.10.0
libtpu: 0.0.40
codegen_flags: <defaults>
</compile_context>

<pallas_src>
import functools

import jax
import jax.numpy as jnp
from jax.experimental import pallas as pl
from jax.experimental.pallas import tpu as pltpu

_LANE = 128      # lane width: output / N dims padded to this
_SUBLANE = 8     # sublane width


def _round_up(n, m):
    return ((n + m - 1) // m) * m


def _tpu_info():
    """(physical VMEM bytes per core, is_v7x) from the device kind string."""
    kind = ""
    try:
        kind = jax.devices()[0].device_kind.lower()
    except Exception:
        pass
    is_v7 = ("v7" in kind) or ("tpu7" in kind)
    phys = (64 << 20) if is_v7 else (128 << 20)   # v7x: 64 MiB/TC, v5e/v6e: 128 MiB
    return phys, is_v7


# --------------------------------------------------------------------------
# One-time parameter preparation (padding + bf16 cast) — NOT per forward call
# --------------------------------------------------------------------------
def prepare_encoder_params(params, weight_dtype=jnp.bfloat16):
    """Pad + cast weights once.

    params: list of (w_t, b) with w_t of shape (in, out) (torch W.T), b (out,).
    Returns list of (w_pad[bf16/f32], b_pad[f32]) where:
      * the first layer's K dim is padded only to the dtype sublane pack
        (8 for f32 / 16 for bf16) — no wasted MXU passes over zeros,
      * every output (N) dim is padded to 128 for lane-dense stores,
      * later layers' K dims equal the previous padded N so the in-kernel
        activation chains without slicing.
    Zero padding is mathematically inert (zero rows/cols, zero bias, relu(0)=0).
    """
    wdt = jnp.dtype(weight_dtype)
    k_align = 8 * (4 // wdt.itemsize)        # 8 for f32, 16 for bf16
    prepared = []
    prev_out_pad = None
    for idx, (w_t, b) in enumerate(params):
        din, dout = w_t.shape
        din_pad = _round_up(din, k_align) if idx == 0 else prev_out_pad
        dout_pad = _round_up(dout, _LANE)
        w_pad = jnp.zeros((din_pad, dout_pad), wdt).at[:din, :dout].set(
            w_t.astype(wdt))
        b_pad = jnp.zeros((1, dout_pad), jnp.float32).at[0, :dout].set(
            b.astype(jnp.float32))
        prepared.append((w_pad, b_pad))
        prev_out_pad = dout_pad
    return prepared


# --------------------------------------------------------------------------
# Fused kernel: whole MLP in one pallas_call, weights resident in VMEM
# --------------------------------------------------------------------------
def _fused_mlp_kernel(*refs, n_layers):
    """refs = (x_ref, w0, b0, ..., w_{L-1}, b_{L-1}, o_ref).

    The running activation lives in vregs/VMEM for the whole chain — no
    intermediate HBM traffic.  Matmuls run in the weights' dtype (bf16) on the
    MXU with f32 accumulation; bias add and ReLU stay in f32 on the VPU.
    """
    x_ref = refs[0]
    o_ref = refs[-1]
    wb = refs[1:-1]

    h = x_ref[...].astype(jnp.float32)
    for layer in range(n_layers):
        w = wb[2 * layer][...]        # (din_pad, dout_pad), bf16 (or f32)
        b = wb[2 * layer + 1][...]    # (1, dout_pad), f32 -> broadcasts
        h = jnp.dot(h.astype(w.dtype), w,
                    preferred_element_type=jnp.float32) + b
        if layer < n_layers - 1:
            h = jnp.maximum(h, 0.0)
    o_ref[...] = h.astype(o_ref.dtype)


def _fused_forward(prepared, x_pad, b_tile, B_pad, single_buffer_weights,
                   footprint_bytes, phys_vmem):
    n_layers = len(prepared)
    _, din_pad0 = x_pad.shape
    dout_pad_last = prepared[-1][0].shape[1]
    dtype = x_pad.dtype
    itemsize = jnp.dtype(dtype).itemsize

    # Constant-index blocks don't need double-buffering (halves weight VMEM).
    weight_mode = (dict(pipeline_mode=pl.Buffered(1))
                   if single_buffer_weights else {})

    in_specs = [pl.BlockSpec((b_tile, din_pad0), lambda i: (i, 0))]
    args = [x_pad]
    flops = 0
    bytes_accessed = x_pad.size * itemsize
    for (w, b) in prepared:
        args += [w, b]
        in_specs += [
            pl.BlockSpec(w.shape, lambda i: (0, 0), **weight_mode),
            pl.BlockSpec(b.shape, lambda i: (0, 0), **weight_mode),
        ]
        flops += 2 * B_pad * w.shape[0] * w.shape[1]
        bytes_accessed += w.size * w.dtype.itemsize + b.size * b.dtype.itemsize
    bytes_accessed += B_pad * dout_pad_last * itemsize

    vmem_limit = int(min(phys_vmem * 0.9,
                         max(footprint_bytes * 1.5, 16 << 20)))

    kernel = functools.partial(_fused_mlp_kernel, n_layers=n_layers)
    return pl.pallas_call(
        kernel,
        out_shape=jax.ShapeDtypeStruct((B_pad, dout_pad_last), dtype),
        grid=(B_pad // b_tile,),
        in_specs=in_specs,
        out_specs=pl.BlockSpec((b_tile, dout_pad_last), lambda i: (i, 0)),
        compiler_params=pltpu.CompilerParams(
            dimension_semantics=("parallel",),     # batch tiles are independent
            vmem_limit_bytes=vmem_limit,
        ),
        cost_estimate=pl.CostEstimate(
            flops=flops, transcendentals=0, bytes_accessed=bytes_accessed),
    )(*args)


# --------------------------------------------------------------------------
# Fallback: per-layer K/N-tiled Linear(+ReLU) when weights don't fit in VMEM
# --------------------------------------------------------------------------
def _linear_layer_kernel(x_ref, w_ref, b_ref, o_ref, acc_ref, *, apply_relu):
    @pl.when(pl.program_id(2) == 0)
    def _init():
        acc_ref[...] = jnp.zeros_like(acc_ref)

    acc_ref[...] += jnp.dot(x_ref[...].astype(w_ref.dtype), w_ref[...],
                            preferred_element_type=jnp.float32)

    @pl.when(pl.program_id(2) == pl.num_programs(2) - 1)
    def _finish():
        y = acc_ref[...] + b_ref[...]
        if apply_relu:
            y = jnp.maximum(y, 0.0)
        o_ref[...] = y.astype(o_ref.dtype)


def _divisor_tile(dim, cap=512):
    for t in (512, 256, 128):
        if t <= cap and t <= dim and dim % t == 0:
            return t
    return dim


def _layerwise_forward(prepared, x_pad, b_tile, B_pad, phys_vmem):
    h = x_pad
    n_layers = len(prepared)
    for idx, (w, b) in enumerate(prepared):
        K, N = w.shape
        tk = _divisor_tile(K)
        tn = _divisor_tile(N)
        apply_relu = idx < n_layers - 1
        kernel = functools.partial(_linear_layer_kernel, apply_relu=apply_relu)
        tile_bytes = ((b_tile * tk + tk * tn + tn + b_tile * tn) * 4 * 2
                      + b_tile * tn * 4)
        h = pl.pallas_call(
            kernel,
            out_shape=jax.ShapeDtypeStruct((B_pad, N), x_pad.dtype),
            grid=(B_pad // b_tile, N // tn, K // tk),
            in_specs=[
                pl.BlockSpec((b_tile, tk), lambda i, j, k: (i, k)),
                pl.BlockSpec((tk, tn), lambda i, j, k: (k, j)),
                pl.BlockSpec((1, tn), lambda i, j, k: (0, j)),
            ],
            out_specs=pl.BlockSpec((b_tile, tn), lambda i, j, k: (i, j)),
            scratch_shapes=[pltpu.VMEM((b_tile, tn), jnp.float32)],
            compiler_params=pltpu.CompilerParams(
                dimension_semantics=("parallel", "parallel", "arbitrary"),
                vmem_limit_bytes=int(min(phys_vmem * 0.9,
                                         max(tile_bytes * 2, 16 << 20))),
            ),
        )(h, w, b)
    return h


# --------------------------------------------------------------------------
# Wrapper
# --------------------------------------------------------------------------
def _choose_batch_tile(batch, is_v7x, max_width_elems, weight_bytes, phys):
    cap = 256 if is_v7x else 512
    b8 = _round_up(max(batch, 1), _SUBLANE)
    if b8 <= cap:
        b_tile = b8
        if is_v7x and b8 >= 2 * _SUBLANE:
            # split into >= 2 grid steps so both TensorCores get work
            b_tile = _round_up((b8 + 1) // 2, _SUBLANE)
    else:
        b_tile = cap
        steps = -(-b8 // b_tile)
        if is_v7x and steps % 2 == 1:
            steps += 1
            b_tile = _round_up(-(-b8 // steps), _SUBLANE)
    # shrink the tile if the activation working set would blow the VMEM budget
    budget = max(int(phys * 0.8) - weight_bytes, 2 << 20)
    per_row_bytes = max_width_elems * 4 * 4
    while b_tile > _SUBLANE and b_tile * per_row_bytes > budget:
        b_tile = max(_SUBLANE, _round_up(b_tile // 2, _SUBLANE))
    B_pad = _round_up(b8, b_tile)
    return b_tile, B_pad


def encoder_forward(prepared, x, *, out_features, single_buffer_weights=True,
                    force_layerwise=False):
    """Encoder forward using pre-prepared (padded, pre-cast) parameters."""
    lead = x.shape[:-1]
    din = x.shape[-1]
    x2 = x.reshape((-1, din))
    B = x2.shape[0]

    din_pad0 = prepared[0][0].shape[0]
    dout_pad_last = prepared[-1][0].shape[1]
    max_width = max(din_pad0, max(w.shape[1] for w, _ in prepared))

    phys, is_v7x = _tpu_info()

    weight_buf = 1 if single_buffer_weights else 2
    weight_bytes = sum(w.size * w.dtype.itemsize + b.size * b.dtype.itemsize
                       for w, b in prepared) * weight_buf

    b_tile, B_pad = _choose_batch_tile(B, is_v7x, max_width, weight_bytes, phys)

    # Only x is padded per call (weights were prepared once, outside the step).
    x_pad = jnp.pad(x2, ((0, B_pad - B), (0, din_pad0 - din)))

    tile_bytes = b_tile * (din_pad0 + dout_pad_last) * 4 * 2   # x/out dbl-buf
    act_bytes = b_tile * max_width * 4 * 3                     # working activations
    footprint = weight_bytes + tile_bytes + act_bytes

    use_fused = (not force_layerwise) and footprint <= int(phys * 0.8)
    if use_fused:
        out_pad = _fused_forward(prepared, x_pad, b_tile, B_pad,
                                 single_buffer_weights, footprint, phys)
    else:
        # Resident-weight footprint exceeds the per-generation VMEM budget:
        # degrade gracefully to the K/N-tiled per-layer path.
        out_pad = _layerwise_forward(prepared, x_pad, b_tile, B_pad, phys)

    return out_pad[:B, :out_features].reshape(lead + (out_features,))


# --------------------------------------------------------------------------
# Parameter init + pure-JAX reference (matches the torch module's math)
# --------------------------------------------------------------------------
def init_encoder_params(key, input_size, intermediate_architecture,
                        bottleneck_size, dtype=jnp.float32):
    """nn.Linear-style init; stores W.T so y = x @ w_t + b."""
    sizes = [input_size] + list(intermediate_architecture) + [bottleneck_size]
    params = []
    for din, dout in zip(sizes[:-1], sizes[1:]):
        key, kw, kb = jax.random.split(key, 3)
        bound = 1.0 / jnp.sqrt(jnp.asarray(din, dtype))
        w = jax.random.uniform(kw, (dout, din), dtype, -bound, bound)
        b = jax.random.uniform(kb, (dout,), dtype, -bound, bound)
        params.append((w.T, b))
    return params


def encoder_reference(params, x, compute_dtype=jnp.float32):
    """Pure-JAX reference; compute_dtype mirrors the kernel's matmul dtype."""
    n_layers = len(params)
    h = x
    for idx, (w_t, b) in enumerate(params):
        h = jnp.dot(h.astype(compute_dtype), w_t.astype(compute_dtype),
                    preferred_element_type=jnp.float32) + b.astype(jnp.float32)
        if idx < n_layers - 1:
            h = jnp.maximum(h, 0.0)
    return h.astype(x.dtype)


if __name__ == "__main__":
    batch = 8
    input_size = 32
    intermediate_architecture = [64, 48]
    bottleneck_size = 16

    key = jax.random.PRNGKey(0)
    key, kx = jax.random.split(key)
    x = jax.random.normal(kx, (batch, input_size), jnp.float32)
    params = init_encoder_params(
        key, input_size, intermediate_architecture, bottleneck_size)

    ref_f32 = encoder_reference(params, x, jnp.float32)

    # Preferred config first (bf16 MXU + single-buffered resident weights);
    # fall back gracefully if the installed JAX rejects pipeline_mode/bf16.
    configs = [
        dict(weight_dtype=jnp.bfloat16, single_buffer_weights=True),
        dict(weight_dtype=jnp.bfloat16, single_buffer_weights=False),
        dict(weight_dtype=jnp.float32, single_buffer_weights=False),
    ]
    out = None
    used = None
    last_err = None
    for cfg in configs:
        try:
            prepared = prepare_encoder_params(params,
                                              weight_dtype=cfg["weight_dtype"])
            fwd = jax.jit(functools.partial(
                encoder_forward, out_features=bottleneck_size,
                single_buffer_weights=cfg["single_buffer_weights"]))
            out = jax.block_until_ready(fwd(prepared, x))
            used = cfg
            break
        except Exception as e:   # defensive retry ladder
            last_err = e
            out = None
    if out is None:
        raise last_err

    # Reference computed with the same matmul dtype as the kernel (tight tol),
    # plus a loose sanity check against the pure-f32 PyTorch-equivalent math.
    ref_matched = encoder_reference(params, x, used["weight_dtype"])
    tol = 1e-4 if used["weight_dtype"] == jnp.bfloat16 else 1e-3
    assert out.shape == (batch, bottleneck_size), out.shape
    assert jnp.allclose(out, ref_matched, atol=tol, rtol=tol), \
        "fused kernel mismatch vs matched-dtype reference"
    assert jnp.allclose(out, ref_f32, atol=1e-1, rtol=1e-1), \
        "fused kernel mismatch vs f32 reference"

    # Exercise the K/N-tiled layerwise fallback (used when resident weights
    # would not fit in VMEM) to make sure it degrades gracefully.
    fwd_fb = jax.jit(functools.partial(
        encoder_forward, out_features=bottleneck_size,
        single_buffer_weights=False, force_layerwise=True))
    out_fb = jax.block_until_ready(fwd_fb(prepared, x))
    assert jnp.allclose(out_fb, ref_matched, atol=tol, rtol=tol), \
        "fallback kernel mismatch vs matched-dtype reference"

    print("KERNEL_OK")
</pallas_src>

<mosaic_0001>
module attributes {stable_mosaic.version = 11 : i64} {
  func.func @_fused_mlp_kernel(%arg0: i32, %arg1: memref<8x32xf32, #tpu.memory_space<vmem>>, %arg2: memref<32x128xbf16, #tpu.memory_space<vmem>>, %arg3: memref<1x128xf32, #tpu.memory_space<vmem>>, %arg4: memref<128x128xbf16, #tpu.memory_space<vmem>>, %arg5: memref<1x128xf32, #tpu.memory_space<vmem>>, %arg6: memref<128x128xbf16, #tpu.memory_space<vmem>>, %arg7: memref<1x128xf32, #tpu.memory_space<vmem>>, %arg8: memref<8x128xf32, #tpu.memory_space<vmem>>) attributes {dimension_semantics = [#tpu.dimension_semantics<parallel>], iteration_bounds = array<i64: 1>, scalar_prefetch = 0 : i64, scratch_operands = 0 : i64, tpu.core_type = #tpu.core_type<tc>, window_params = [{transform_indices = @transform_0, window_bounds = array<i64: 8, 32>}, {pipeline_mode = #tpu.pipeline_mode<synchronous>, transform_indices = @transform_1, window_bounds = array<i64: 32, 128>}, {pipeline_mode = #tpu.pipeline_mode<synchronous>, transform_indices = @transform_2, window_bounds = array<i64: 1, 128>}, {pipeline_mode = #tpu.pipeline_mode<synchronous>, transform_indices = @transform_3, window_bounds = array<i64: 128, 128>}, {pipeline_mode = #tpu.pipeline_mode<synchronous>, transform_indices = @transform_4, window_bounds = array<i64: 1, 128>}, {pipeline_mode = #tpu.pipeline_mode<synchronous>, transform_indices = @transform_5, window_bounds = array<i64: 128, 128>}, {pipeline_mode = #tpu.pipeline_mode<synchronous>, transform_indices = @transform_6, window_bounds = array<i64: 1, 128>}, {transform_indices = @transform_7, window_bounds = array<i64: 8, 128>}]} {
    %c0 = arith.constant 0 : index
    %c0_0 = arith.constant 0 : index
    %0 = vector.load %arg1[%c0, %c0_0] : memref<8x32xf32, #tpu.memory_space<vmem>>, vector<8x32xf32>
    %c0_1 = arith.constant 0 : index
    %c0_2 = arith.constant 0 : index
    %1 = vector.load %arg2[%c0_1, %c0_2] : memref<32x128xbf16, #tpu.memory_space<vmem>>, vector<32x128xbf16>
    %c0_3 = arith.constant 0 : index
    %c0_4 = arith.constant 0 : index
    %2 = vector.load %arg3[%c0_3, %c0_4] : memref<1x128xf32, #tpu.memory_space<vmem>>, vector<1x128xf32>
    %3 = arith.truncf %0 : vector<8x32xf32> to vector<8x32xbf16>
    %cst = arith.constant dense<0.000000e+00> : vector<8x128xf32>
    %4 = tpu.matmul %3, %1, %cst {dimension_numbers = #tpu.dot_dimension_numbers<[1], [0], [0], [1], [0, 0, 1, 1], [], []>} : vector<8x32xbf16>, vector<32x128xbf16>, vector<8x128xf32> -> vector<8x128xf32>
    %5 = vector.broadcast %2 : vector<1x128xf32> to vector<8x128xf32>
    %6 = arith.addf %4, %5 : vector<8x128xf32>
    %cst_5 = arith.constant 0.000000e+00 : f32
    %7 = vector.broadcast %cst_5 : f32 to vector<8x128xf32>
    %8 = arith.maximumf %6, %7 : vector<8x128xf32>
    %c0_6 = arith.constant 0 : index
    %c0_7 = arith.constant 0 : index
    %9 = vector.load %arg4[%c0_6, %c0_7] : memref<128x128xbf16, #tpu.memory_space<vmem>>, vector<128x128xbf16>
    %c0_8 = arith.constant 0 : index
    %c0_9 = arith.constant 0 : index
    %10 = vector.load %arg5[%c0_8, %c0_9] : memref<1x128xf32, #tpu.memory_space<vmem>>, vector<1x128xf32>
    %11 = arith.truncf %8 : vector<8x128xf32> to vector<8x128xbf16>
    %cst_10 = arith.constant dense<0.000000e+00> : vector<8x128xf32>
    %12 = tpu.matmul %11, %9, %cst_10 {dimension_numbers = #tpu.dot_dimension_numbers<[1], [0], [0], [1], [0, 0, 1, 1], [], []>} : vector<8x128xbf16>, vector<128x128xbf16>, vector<8x128xf32> -> vector<8x128xf32>
    %13 = vector.broadcast %10 : vector<1x128xf32> to vector<8x128xf32>
    %14 = arith.addf %12, %13 : vector<8x128xf32>
    %cst_11 = arith.constant 0.000000e+00 : f32
    %15 = vector.broadcast %cst_11 : f32 to vector<8x128xf32>
    %16 = arith.maximumf %14, %15 : vector<8x128xf32>
    %c0_12 = arith.constant 0 : index
    %c0_13 = arith.constant 0 : index
    %17 = vector.load %arg6[%c0_12, %c0_13] : memref<128x128xbf16, #tpu.memory_space<vmem>>, vector<128x128xbf16>
    %c0_14 = arith.constant 0 : index
    %c0_15 = arith.constant 0 : index
    %18 = vector.load %arg7[%c0_14, %c0_15] : memref<1x128xf32, #tpu.memory_space<vmem>>, vector<1x128xf32>
    %19 = arith.truncf %16 : vector<8x128xf32> to vector<8x128xbf16>
    %cst_16 = arith.constant dense<0.000000e+00> : vector<8x128xf32>
    %20 = tpu.matmul %19, %17, %cst_16 {dimension_numbers = #tpu.dot_dimension_numbers<[1], [0], [0], [1], [0, 0, 1, 1], [], []>} : vector<8x128xbf16>, vector<128x128xbf16>, vector<8x128xf32> -> vector<8x128xf32>
    %21 = vector.broadcast %18 : vector<1x128xf32> to vector<8x128xf32>
    %22 = arith.addf %20, %21 : vector<8x128xf32>
    %c0_17 = arith.constant 0 : index
    %c0_18 = arith.constant 0 : index
    %23 = vector.load %arg8[%c0_17, %c0_18] : memref<8x128xf32, #tpu.memory_space<vmem>>, vector<8x128xf32>
    tpu.vector_store %arg8[%c0_17, %c0_18], %22 {strides = array<i32>} : memref<8x128xf32, #tpu.memory_space<vmem>>, vector<8x128xf32>,
    return
  }
  func.func @transform_0(%arg0: i32) -> (i32, i32) {
    %c0_i32 = arith.constant 0 : i32
    %c0_i32_0 = arith.constant 0 : i32
    return %arg0, %c0_i32 : i32, i32
  }
  func.func @transform_1(%arg0: i32) -> (i32, i32) {
    %c0_i32 = arith.constant 0 : i32
    %c0_i32_0 = arith.constant 0 : i32
    %c0_i32_1 = arith.constant 0 : i32
    return %c0_i32, %c0_i32_0 : i32, i32
  }
  func.func @transform_2(%arg0: i32) -> (i32, i32) {
    %c0_i32 = arith.constant 0 : i32
    %c0_i32_0 = arith.constant 0 : i32
    %c0_i32_1 = arith.constant 0 : i32
    return %c0_i32, %c0_i32_0 : i32, i32
  }
  func.func @transform_3(%arg0: i32) -> (i32, i32) {
    %c0_i32 = arith.constant 0 : i32
    %c0_i32_0 = arith.constant 0 : i32
    %c0_i32_1 = arith.constant 0 : i32
    return %c0_i32, %c0_i32_0 : i32, i32
  }
  func.func @transform_4(%arg0: i32) -> (i32, i32) {
    %c0_i32 = arith.constant 0 : i32
    %c0_i32_0 = arith.constant 0 : i32
    %c0_i32_1 = arith.constant 0 : i32
    return %c0_i32, %c0_i32_0 : i32, i32
  }
  func.func @transform_5(%arg0: i32) -> (i32, i32) {
    %c0_i32 = arith.constant 0 : i32
    %c0_i32_0 = arith.constant 0 : i32
    %c0_i32_1 = arith.constant 0 : i32
    return %c0_i32, %c0_i32_0 : i32, i32
  }
  func.func @transform_6(%arg0: i32) -> (i32, i32) {
    %c0_i32 = arith.constant 0 : i32
    %c0_i32_0 = arith.constant 0 : i32
    %c0_i32_1 = arith.constant 0 : i32
    return %c0_i32, %c0_i32_0 : i32, i32
  }
  func.func @transform_7(%arg0: i32) -> (i32, i32) {
    %c0_i32 = arith.constant 0 : i32
    %c0_i32_0 = arith.constant 0 : i32
    return %arg0, %c0_i32 : i32, i32
  }
}

module attributes {stable_mosaic.version = 11 : i64} {
  func.func @_fused_mlp_kernel(%arg0: i32, %arg1: memref<8x32xf32, #tpu.memory_space<vmem>>, %arg2: memref<32x128xbf16, #tpu.memory_space<vmem>>, %arg3: memref<1x128xf32, #tpu.memory_space<vmem>>, %arg4: memref<128x128xbf16, #tpu.memory_space<vmem>>, %arg5: memref<1x128xf32, #tpu.memory_space<vmem>>, %arg6: memref<128x128xbf16, #tpu.memory_space<vmem>>, %arg7: memref<1x128xf32, #tpu.memory_space<vmem>>, %arg8: memref<8x128xf32, #tpu.memory_space<vmem>>) attributes {dimension_semantics = [#tpu.dimension_semantics<parallel>], iteration_bounds = array<i64: 1>, scalar_prefetch = 0 : i64, scratch_operands = 0 : i64, tpu.core_type = #tpu.core_type<tc>, window_params = [{transform_indices = @transform_0, window_bounds = array<i64: 8, 32>}, {pipeline_mode = #tpu.pipeline_mode<synchronous>, transform_indices = @transform_1, window_bounds = array<i64: 32, 128>}, {pipeline_mode = #tpu.pipeline_mode<synchronous>, transform_indices = @transform_2, window_bounds = array<i64: 1, 128>}, {pipeline_mode = #tpu.pipeline_mode<synchronous>, transform_indices = @transform_3, window_bounds = array<i64: 128, 128>}, {pipeline_mode = #tpu.pipeline_mode<synchronous>, transform_indices = @transform_4, window_bounds = array<i64: 1, 128>}, {pipeline_mode = #tpu.pipeline_mode<synchronous>, transform_indices = @transform_5, window_bounds = array<i64: 128, 128>}, {pipeline_mode = #tpu.pipeline_mode<synchronous>, transform_indices = @transform_6, window_bounds = array<i64: 1, 128>}, {transform_indices = @transform_7, window_bounds = array<i64: 8, 128>}]} {
    %c0 = arith.constant 0 : index
    %c0_0 = arith.constant 0 : index
    %0 = vector.load %arg1[%c0, %c0_0] : memref<8x32xf32, #tpu.memory_space<vmem>>, vector<8x32xf32>
    %c0_1 = arith.constant 0 : index
    %c0_2 = arith.constant 0 : index
    %1 = vector.load %arg2[%c0_1, %c0_2] : memref<32x128xbf16, #tpu.memory_space<vmem>>, vector<32x128xbf16>
    %c0_3 = arith.constant 0 : index
    %c0_4 = arith.constant 0 : index
    %2 = vector.load %arg3[%c0_3, %c0_4] : memref<1x128xf32, #tpu.memory_space<vmem>>, vector<1x128xf32>
    %3 = arith.truncf %0 : vector<8x32xf32> to vector<8x32xbf16>
    %cst = arith.constant dense<0.000000e+00> : vector<8x128xf32>
    %4 = tpu.matmul %3, %1, %cst {dimension_numbers = #tpu.dot_dimension_numbers<[1], [0], [0], [1], [0, 0, 1, 1], [], []>} : vector<8x32xbf16>, vector<32x128xbf16>, vector<8x128xf32> -> vector<8x128xf32>
    %5 = vector.broadcast %2 : vector<1x128xf32> to vector<8x128xf32>
    %6 = arith.addf %4, %5 : vector<8x128xf32>
    %cst_5 = arith.constant 0.000000e+00 : f32
    %7 = vector.broadcast %cst_5 : f32 to vector<8x128xf32>
    %8 = arith.maximumf %6, %7 : vector<8x128xf32>
    %c0_6 = arith.constant 0 : index
    %c0_7 = arith.constant 0 : index
    %9 = vector.load %arg4[%c0_6, %c0_7] : memref<128x128xbf16, #tpu.memory_space<vmem>>, vector<128x128xbf16>
    %c0_8 = arith.constant 0 : index
    %c0_9 = arith.constant 0 : index
    %10 = vector.load %arg5[%c0_8, %c0_9] : memref<1x128xf32, #tpu.memory_space<vmem>>, vector<1x128xf32>
    %11 = arith.truncf %8 : vector<8x128xf32> to vector<8x128xbf16>
    %cst_10 = arith.constant dense<0.000000e+00> : vector<8x128xf32>
    %12 = tpu.matmul %11, %9, %cst_10 {dimension_numbers = #tpu.dot_dimension_numbers<[1], [0], [0], [1], [0, 0, 1, 1], [], []>} : vector<8x128xbf16>, vector<128x128xbf16>, vector<8x128xf32> -> vector<8x128xf32>
    %13 = vector.broadcast %10 : vector<1x128xf32> to vector<8x128xf32>
    %14 = arith.addf %12, %13 : vector<8x128xf32>
    %cst_11 = arith.constant 0.000000e+00 : f32
    %15 = vector.broadcast %cst_11 : f32 to vector<8x128xf32>
    %16 = arith.maximumf %14, %15 : vector<8x128xf32>
    %c0_12 = arith.constant 0 : index
    %c0_13 = arith.constant 0 : index
    %17 = vector.load %arg6[%c0_12, %c0_13] : memref<128x128xbf16, #tpu.memory_space<vmem>>, vector<128x128xbf16>
    %c0_14 = arith.constant 0 : index
    %c0_15 = arith.constant 0 : index
    %18 = vector.load %arg7[%c0_14, %c0_15] : memref<1x128xf32, #tpu.memory_space<vmem>>, vector<1x128xf32>
    %19 = arith.truncf %16 : vector<8x128xf32> to vector<8x128xbf16>
    %cst_16 = arith.constant dense<0.000000e+00> : vector<8x128xf32>
    %20 = tpu.matmul %19, %17, %cst_16 {dimension_numbers = #tpu.dot_dimension_numbers<[1], [0], [0], [1], [0, 0, 1, 1], [], []>} : vector<8x128xbf16>, vector<128x128xbf16>, vector<8x128xf32> -> vector<8x128xf32>
    %21 = vector.broadcast %18 : vector<1x128xf32> to vector<8x128xf32>
    %22 = arith.addf %20, %21 : vector<8x128xf32>
    %c0_17 = arith.constant 0 : index
    %c0_18 = arith.constant 0 : index
    %23 = vector.load %arg8[%c0_17, %c0_18] : memref<8x128xf32, #tpu.memory_space<vmem>>, vector<8x128xf32>
    tpu.vector_store %arg8[%c0_17, %c0_18], %22 {strides = array<i32>} : memref<8x128xf32, #tpu.memory_space<vmem>>, vector<8x128xf32>,
    return
  }
  func.func @transform_0(%arg0: i32) -> (i32, i32) {
    %c0_i32 = arith.constant 0 : i32
    %c0_i32_0 = arith.constant 0 : i32
    return %arg0, %c0_i32 : i32, i32
  }
  func.func @transform_1(%arg0: i32) -> (i32, i32) {
    %c0_i32 = arith.constant 0 : i32
    %c0_i32_0 = arith.constant 0 : i32
    %c0_i32_1 = arith.constant 0 : i32
    return %c0_i32, %c0_i32_0 : i32, i32
  }
  func.func @transform_2(%arg0: i32) -> (i32, i32) {
    %c0_i32 = arith.constant 0 : i32
    %c0_i32_0 = arith.constant 0 : i32
    %c0_i32_1 = arith.constant 0 : i32
    return %c0_i32, %c0_i32_0 : i32, i32
  }
  func.func @transform_3(%arg0: i32) -> (i32, i32) {
    %c0_i32 = arith.constant 0 : i32
    %c0_i32_0 = arith.constant 0 : i32
    %c0_i32_1 = arith.constant 0 : i32
    return %c0_i32, %c0_i32_0 : i32, i32
  }
  func.func @transform_4(%arg0: i32) -> (i32, i32) {
    %c0_i32 = arith.constant 0 : i32
    %c0_i32_0 = arith.constant 0 : i32
    %c0_i32_1 = arith.constant 0 : i32
    return %c0_i32, %c0_i32_0 : i32, i32
  }
  func.func @transform_5(%arg0: i32) -> (i32, i32) {
    %c0_i32 = arith.constant 0 : i32
    %c0_i32_0 = arith.constant 0 : i32
    %c0_i32_1 = arith.constant 0 : i32
    return %c0_i32, %c0_i32_0 : i32, i32
  }
  func.func @transform_6(%arg0: i32) -> (i32, i32) {
    %c0_i32 = arith.constant 0 : i32
    %c0_i32_0 = arith.constant 0 : i32
    %c0_i32_1 = arith.constant 0 : i32
    return %c0_i32, %c0_i32_0 : i32, i32
  }
  func.func @transform_7(%arg0: i32) -> (i32, i32) {
    %c0_i32 = arith.constant 0 : i32
    %c0_i32_0 = arith.constant 0 : i32
    return %arg0, %c0_i32 : i32, i32
  }
}

module attributes {stable_mosaic.version = 11 : i64} {
  func.func @_fused_mlp_kernel(%arg0: i32, %arg1: memref<8x32xf32, #tpu.memory_space<vmem>>, %arg2: memref<32x128xf32, #tpu.memory_space<vmem>>, %arg3: memref<1x128xf32, #tpu.memory_space<vmem>>, %arg4: memref<128x128xf32, #tpu.memory_space<vmem>>, %arg5: memref<1x128xf32, #tpu.memory_space<vmem>>, %arg6: memref<128x128xf32, #tpu.memory_space<vmem>>, %arg7: memref<1x128xf32, #tpu.memory_space<vmem>>, %arg8: memref<8x128xf32, #tpu.memory_space<vmem>>) attributes {dimension_semantics = [#tpu.dimension_semantics<parallel>], iteration_bounds = array<i64: 1>, scalar_prefetch = 0 : i64, scratch_operands = 0 : i64, tpu.core_type = #tpu.core_type<tc>, window_params = [{transform_indices = @transform_0, window_bounds = array<i64: 8, 32>}, {pipeline_mode = #tpu.pipeline_mode<synchronous>, transform_indices = @transform_1, window_bounds = array<i64: 32, 128>}, {pipeline_mode = #tpu.pipeline_mode<synchronous>, transform_indices = @transform_2, window_bounds = array<i64: 1, 128>}, {pipeline_mode = #tpu.pipeline_mode<synchronous>, transform_indices = @transform_3, window_bounds = array<i64: 128, 128>}, {pipeline_mode = #tpu.pipeline_mode<synchronous>, transform_indices = @transform_4, window_bounds = array<i64: 1, 128>}, {pipeline_mode = #tpu.pipeline_mode<synchronous>, transform_indices = @transform_5, window_bounds = array<i64: 128, 128>}, {pipeline_mode = #tpu.pipeline_mode<synchronous>, transform_indices = @transform_6, window_bounds = array<i64: 1, 128>}, {transform_indices = @transform_7, window_bounds = array<i64: 8, 128>}]} {
    %c0 = arith.constant 0 : index
    %c0_0 = arith.constant 0 : index
    %0 = vector.load %arg1[%c0, %c0_0] : memref<8x32xf32, #tpu.memory_space<vmem>>, vector<8x32xf32>
    %c0_1 = arith.constant 0 : index
    %c0_2 = arith.constant 0 : index
    %1 = vector.load %arg2[%c0_1, %c0_2] : memref<32x128xf32, #tpu.memory_space<vmem>>, vector<32x128xf32>
    %c0_3 = arith.constant 0 : index
    %c0_4 = arith.constant 0 : index
    %2 = vector.load %arg3[%c0_3, %c0_4] : memref<1x128xf32, #tpu.memory_space<vmem>>, vector<1x128xf32>
    %cst = arith.constant dense<0.000000e+00> : vector<8x128xf32>
    %3 = tpu.matmul %0, %1, %cst {dimension_numbers = #tpu.dot_dimension_numbers<[1], [0], [0], [1], [0, 0, 1, 1], [], []>} : vector<8x32xf32>, vector<32x128xf32>, vector<8x128xf32> -> vector<8x128xf32>
    %4 = vector.broadcast %2 : vector<1x128xf32> to vector<8x128xf32>
    %5 = arith.addf %3, %4 : vector<8x128xf32>
    %cst_5 = arith.constant 0.000000e+00 : f32
    %6 = vector.broadcast %cst_5 : f32 to vector<8x128xf32>
    %7 = arith.maximumf %5, %6 : vector<8x128xf32>
    %c0_6 = arith.constant 0 : index
    %c0_7 = arith.constant 0 : index
    %8 = vector.load %arg4[%c0_6, %c0_7] : memref<128x128xf32, #tpu.memory_space<vmem>>, vector<128x128xf32>
    %c0_8 = arith.constant 0 : index
    %c0_9 = arith.constant 0 : index
    %9 = vector.load %arg5[%c0_8, %c0_9] : memref<1x128xf32, #tpu.memory_space<vmem>>, vector<1x128xf32>
    %cst_10 = arith.constant dense<0.000000e+00> : vector<8x128xf32>
    %10 = tpu.matmul %7, %8, %cst_10 {dimension_numbers = #tpu.dot_dimension_numbers<[1], [0], [0], [1], [0, 0, 1, 1], [], []>} : vector<8x128xf32>, vector<128x128xf32>, vector<8x128xf32> -> vector<8x128xf32>
    %11 = vector.broadcast %9 : vector<1x128xf32> to vector<8x128xf32>
    %12 = arith.addf %10, %11 : vector<8x128xf32>
    %cst_11 = arith.constant 0.000000e+00 : f32
    %13 = vector.broadcast %cst_11 : f32 to vector<8x128xf32>
    %14 = arith.maximumf %12, %13 : vector<8x128xf32>
    %c0_12 = arith.constant 0 : index
    %c0_13 = arith.constant 0 : index
    %15 = vector.load %arg6[%c0_12, %c0_13] : memref<128x128xf32, #tpu.memory_space<vmem>>, vector<128x128xf32>
    %c0_14 = arith.constant 0 : index
    %c0_15 = arith.constant 0 : index
    %16 = vector.load %arg7[%c0_14, %c0_15] : memref<1x128xf32, #tpu.memory_space<vmem>>, vector<1x128xf32>
    %cst_16 = arith.constant dense<0.000000e+00> : vector<8x128xf32>
    %17 = tpu.matmul %14, %15, %cst_16 {dimension_numbers = #tpu.dot_dimension_numbers<[1], [0], [0], [1], [0, 0, 1, 1], [], []>} : vector<8x128xf32>, vector<128x128xf32>, vector<8x128xf32> -> vector<8x128xf32>
    %18 = vector.broadcast %16 : vector<1x128xf32> to vector<8x128xf32>
    %19 = arith.addf %17, %18 : vector<8x128xf32>
    %c0_17 = arith.constant 0 : index
    %c0_18 = arith.constant 0 : index
    %20 = vector.load %arg8[%c0_17, %c0_18] : memref<8x128xf32, #tpu.memory_space<vmem>>, vector<8x128xf32>
    tpu.vector_store %arg8[%c0_17, %c0_18], %19 {strides = array<i32>} : memref<8x128xf32, #tpu.memory_space<vmem>>, vector<8x128xf32>,
    return
  }
  func.func @transform_0(%arg0: i32) -> (i32, i32) {
    %c0_i32 = arith.constant 0 : i32
    %c0_i32_0 = arith.constant 0 : i32
    return %arg0, %c0_i32 : i32, i32
  }
  func.func @transform_1(%arg0: i32) -> (i32, i32) {
    %c0_i32 = arith.constant 0 : i32
    %c0_i32_0 = arith.constant 0 : i32
    %c0_i32_1 = arith.constant 0 : i32
    return %c0_i32, %c0_i32_0 : i32, i32
  }
  func.func @transform_2(%arg0: i32) -> (i32, i32) {
    %c0_i32 = arith.constant 0 : i32
    %c0_i32_0 = arith.constant 0 : i32
    %c0_i32_1 = arith.constant 0 : i32
    return %c0_i32, %c0_i32_0 : i32, i32
  }
  func.func @transform_3(%arg0: i32) -> (i32, i32) {
    %c0_i32 = arith.constant 0 : i32
    %c0_i32_0 = arith.constant 0 : i32
    %c0_i32_1 = arith.constant 0 : i32
    return %c0_i32, %c0_i32_0 : i32, i32
  }
  func.func @transform_4(%arg0: i32) -> (i32, i32) {
    %c0_i32 = arith.constant 0 : i32
    %c0_i32_0 = arith.constant 0 : i32
    %c0_i32_1 = arith.constant 0 : i32
    return %c0_i32, %c0_i32_0 : i32, i32
  }
  func.func @transform_5(%arg0: i32) -> (i32, i32) {
    %c0_i32 = arith.constant 0 : i32
    %c0_i32_0 = arith.constant 0 : i32
    %c0_i32_1 = arith.constant 0 : i32
    return %c0_i32, %c0_i32_0 : i32, i32
  }
  func.func @transform_6(%arg0: i32) -> (i32, i32) {
    %c0_i32 = arith.constant 0 : i32
    %c0_i32_0 = arith.constant 0 : i32
    %c0_i32_1 = arith.constant 0 : i32
    return %c0_i32, %c0_i32_0 : i32, i32
  }
  func.func @transform_7(%arg0: i32) -> (i32, i32) {
    %c0_i32 = arith.constant 0 : i32
    %c0_i32_0 = arith.constant 0 : i32
    return %arg0, %c0_i32 : i32, i32
  }
}

</mosaic_0001>

<bundles_post_ra>
// kernel: encoder_forward.1
= control target key start
LH: loop header
LB: loop body
LE: loop exit
PB: predicated region body
PF: predicated region fallthrough
CT: control target
= control target key end

     0   :  { %12 = vsyncpa [#allocation3], 0  ;;  %s653_s0 = inlined_call_operand.hbm [shape: f32[8,32], index: 0, kind: input, shape index: {}]   ;;  %s654_s1 = inlined_call_operand.hbm [shape: bf16[32,128], index: 1, kind: input, shape index: {}]   ;;  %s655_s2 = inlined_call_operand.hbm [shape: f32[1,128], index: 2, kind: input, shape index: {}]   ;;  %s656_s3 = inlined_call_operand.hbm [shape: bf16[128,128], index: 3, kind: input, shape index: {}]   ;;  %s657_s4 = inlined_call_operand.vmem [shape: f32[1,128], index: 4, kind: input, shape index: {}]   ;;  %s658_s5 = inlined_call_operand.hbm [shape: bf16[128,128], index: 5, kind: input, shape index: {}]   ;;  %s659_s6 = inlined_call_operand.vmem [shape: f32[1,128], index: 6, kind: input, shape index: {}]   ;;  %s660_s7 = inlined_call_operand.hbm [shape: f32[8,128], index: 7, kind: output, shape index: {}]  }
   0x1   :  { %13 = vsyncpa [#allocation6], 0 }
   0x2   :  { %14 = vsyncpa [#allocation9], 0  ;;  %s31_s26 = sshll.u32 %s654_s1, 4  ;;  %s32_s26 = int_to_ptr.hbm [resolvable:$true] %s31_s26 }
   0x3   :  { %15 = vsyncpa [#allocation4], 0  ;;  %s581_s27 = smov [#allocation5]   ;;  %s55_s8 = sshll.u32 %s656_s3, 4  ;;  %s56_s8 = int_to_ptr.hbm [resolvable:$true] %s55_s8 }
   0x4   :  { %s33_s28 = sshll.u32 %s581_s27, 4  ;;  %s582_s9 = smov 64   ;;  %s34_s28 = int_to_ptr.vmem [resolvable:$true] %s33_s28 }
   0x5   :  { %s583_s10 = smov 4   ;;  %s584_s11 = smov [#allocation8]  }
   0x6   :  { %39 = dma.hbm_to_vmem [thread:$0]  %s32_s26, 256, %s34_s28, [#allocation6], %s582_s9, %s582_s9, %s583_s10  }
   0x7   :  { %s57_s12 = sshll.u32 %s584_s11, 4  ;;  %s21_s15 = sshll.u32 %s653_s0, 4  ;;  %s58_s12 = int_to_ptr.vmem [resolvable:$true] %s57_s12  ;;  %s22_s15 = int_to_ptr.hbm [resolvable:$true] %s21_s15 }
   0x8   :  { %63 = dma.hbm_to_vmem [thread:$0]  %s56_s8, 1024, %s58_s12, [#allocation9], %s582_s9, %s582_s9, %s583_s10  }
   0x9   :  { %s45_s17 = sshll.u32 %s655_s2, 4  ;;  %s585_s18 = smov [#allocation2]   ;;  %s46_s17 = int_to_ptr.hbm [resolvable:$true] %s45_s17 }
   0xa   :  { %s23_s19 = sshll.u32 %s585_s18, 4  ;;  %s586_s3 = smov [#allocation7]   ;;  %s24_s19 = int_to_ptr.vmem [resolvable:$true] %s23_s19 }
   0xb   :  { %26 = dma.hbm_to_vmem [thread:$0]  %s22_s15, 128, %s24_s19, [#allocation3]  }
   0xc   :  { %s47_s20 = sshll.u32 %s586_s3, 4  ;;  %s70_s23 = sshll.u32 %s658_s5, 4  ;;  %s48_s20 = int_to_ptr.vmem [resolvable:$true] %s47_s20  ;;  %s71_s23 = int_to_ptr.hbm [resolvable:$true] %s70_s23 }
   0xd   :  { %50 = dma.hbm_to_vmem [thread:$0]  %s46_s17, 16, %s48_s20, [#allocation6]  }
   0xe   :  { %s587_s0 = smov [#allocation10]  }
   0xf   :  { %s72_s24 = sshll.u32 %s587_s0, 4  ;;  %s73_s24 = int_to_ptr.vmem [resolvable:$true] %s72_s24 }
  0x10   :  { %78 = dma.hbm_to_vmem [thread:$0]  %s71_s23, 1024, %s73_s24, [#allocation9], %s582_s9, %s582_s9, %s583_s10  }
  0x11   :  { %573 = dma.done.wait [#allocation3], 128  }
  0x12   :  { %574 = vsyncadd [#allocation3], 4294967168 }
  0x13   :  { %575 = dma.done.wait [#allocation6], 272  }
  0x14   :  { %576 = vsyncadd [#allocation6], 4294967024 }
  0x15   :  { %577 = dma.done.wait [#allocation9], 2048  }
  0x16   :  { %578 = vsyncadd [#allocation9], 4294965248  ;;  %v401_v0 = vld [vmem:[#allocation5 + $0x8] sm:$0xff]  ;;  %v400_v2 = vld [vmem:[#allocation5] sm:$0xff]  ;;  %vm124_vm0 = vcmask 261120   ;;  %s588_s27 = smov [#allocation11]  }
  0x17   :  { %v409_v1 = vld [vmem:[#allocation8 + $0x38] sm:$0xff]  ;;  %134 = vmatpush.bf16.msra.mxu0 %v401_v0  ;;  %v102_v3 = vld [vmem:[#allocation2] sm:$0xff]  ;;  %v408_v4 = vld [vmem:[#allocation8 + $0x30] sm:$0xff]  ;;  %s313_s28 = sshll.u32 %s588_s27, 4  ;;  %s315_s8 = sshll.u32 %s660_s7, 4  ;;  %s314_s28 = int_to_ptr.vmem [resolvable:$true] %s313_s28  ;;  %s316_s8 = int_to_ptr.hbm [resolvable:$true] %s315_s8 }
  0x18   :  { %211 = vmatpush.bf16.msra.mxu1 %v409_v1  ;;  %v108_v5 = vpack.c.bf16 %v102_v3, %v102_v3  ;;  %v407_v6 = vld [vmem:[#allocation8 + $0x28] sm:$0xff]  ;;  %v406_v7 = vld [vmem:[#allocation8 + $0x20] sm:$0xff]  ;;  %v405_v8 = vld [vmem:[#allocation8 + $0x18] sm:$0xff] }
  0x19   :  { %v404_v9 = vld [vmem:[#allocation8 + $0x10] sm:$0xff]  ;;  %v403_v10 = vld [vmem:[#allocation8 + $0x8] sm:$0xff]  ;;  %v402_v11 = vld [vmem:[#allocation8] sm:$0xff] }
  0x1a   :  { %v417_v12 = vld [vmem:[#allocation10 + $0x38] sm:$0xff]  ;;  %v416_v13 = vld [vmem:[#allocation10 + $0x30] sm:$0xff]  ;;  %v415_v14 = vld [vmem:[#allocation10 + $0x28] sm:$0xff] }
  0x1b   :  { %135 = vmatpush.bf16.msra.mxu0 %v400_v2  ;;  %294 = vmatpush.bf16.msra.mxu2 %v417_v12  ;;  %v414_v15 = vld [vmem:[#allocation10 + $0x20] sm:$0xff]  ;;  %v413_v16 = vld [vmem:[#allocation10 + $0x18] sm:$0xff]  ;;  %v412_v17 = vld [vmem:[#allocation10 + $0x10] sm:$0xff] }
  0x1c   :  { %212 = vmatpush.bf16.msra.mxu1 %v408_v4  ;;  %v426_v18 = vld [vmem:[#allocation7] ss:$0 sm:$0xff]  ;;  %v411_v24 = vld [vmem:[#allocation10 + $0x8] sm:$0xff]  ;;  %v410_v25 = vld [vmem:[#allocation10] sm:$0xff] }
  0x1d   :  { %v427_v26 = vld [vmem:[%s657_s4] ss:$0 sm:$0xff] }
  0x1e   :  { %335 = vmatmul.msk.bf16.vlgmr.msra.gmra.mxu0 %vm124_vm0, %v108_v5  ;;  %v428_v32 = vld [vmem:[%s659_s6] ss:$0 sm:$0xff] }
  0x1f   :  { %295 = vmatpush.bf16.msra.mxu2 %v416_v13 }
  0x20   :  { %213 = vmatpush.bf16.msra.mxu1 %v407_v6 }
  0x23   :  { %296 = vmatpush.bf16.msra.mxu2 %v415_v14 }
  0x24   :  { %214 = vmatpush.bf16.msra.mxu1 %v406_v7 }
  0x27   :  { %297 = vmatpush.bf16.msra.mxu2 %v414_v15 }
  0x28   :  { %215 = vmatpush.bf16.msra.mxu1 %v405_v8 }
  0x2b   :  { %298 = vmatpush.bf16.msra.mxu2 %v413_v16 }
  0x2c   :  { %216 = vmatpush.bf16.msra.mxu1 %v404_v9 }
  0x2f   :  { %299 = vmatpush.bf16.msra.mxu2 %v412_v17 }
  0x30   :  { %217 = vmatpush.bf16.msra.mxu1 %v403_v10 }
  0x33   :  { %300 = vmatpush.bf16.msra.mxu2 %v411_v24 }
  0x34   :  { %218 = vmatpush.bf16.msra.mxu1 %v402_v11 }
  0x37   :  { %301 = vmatpush.bf16.msra.mxu2 %v410_v25 }
  0x9b   :  { %v137_v19 = vpop.f32.mrf.mxu0 }
  0x9c   :  { %v138_v20 = vadd.f32 %v426_v18, %v137_v19 }
  0x9e   :  { %v141_v21 = vmax.f32 %v138_v20, 0.0 }
  0xa0   :  { %v159_v22 = vpack.c.bf16 %v141_v21, %v141_v21 }
  0xa2   :  { %219 = vmatmul.bf16.vlgmr.msra.gmra.mxu1 %v159_v22 }
  0xa3   :  { %v139_v23 = vpop.f32.mrf.mxu0 }
 0x11f   :  { %v220_v27 = vpop.f32.mrf.mxu1 }
 0x120   :  { %v221_v28 = vadd.f32 %v427_v26, %v220_v27 }
 0x122   :  { %v224_v29 = vmax.f32 %v221_v28, 0.0 }
 0x124   :  { %v242_v30 = vpack.c.bf16 %v224_v29, %v224_v29 }
 0x126   :  { %302 = vmatmul.bf16.vlgmr.msra.gmra.mxu2 %v242_v30 }
 0x127   :  { %v222_v31 = vpop.f32.mrf.mxu1 }
 0x1a9   :  { %v303_v33 = vpop.f32.mrf.mxu2 }
 0x1aa   :  { %v304_v34 = vadd.f32 %v428_v32, %v303_v33 }
 0x1ac   :  { %307 = vst [vmem:[#allocation11] sm:$0xff] %v304_v34 }
 0x1ad   :  { %318 = dma.vmem_to_hbm [thread:$0]  %s314_s28, 128, %s316_s8, [#allocation4]  }
 0x1b1   :  { %v305_v35 = vpop.f32.mrf.mxu2 }
 0x1b2   :  { %579 = dma.done.wait [#allocation4], 128  }
 0x1b3   :  { %580 = vsyncadd [#allocation4], 4294967168 }
 0x1b4   :  { %323 = vsyncpa [#allocation3], 1 }
 0x1b5   :  { %324 = vsyncpa [#allocation6], 1 }
 0x1b6   :  { %325 = vsyncpa [#allocation9], 1 }
 0x1b7   :  { %326 = vsyncpa [#allocation4], 1 }

// kernel: encoder_forward.1
= control target key start
LH: loop header
LB: loop body
LE: loop exit
PB: predicated region body
PF: predicated region fallthrough
CT: control target
= control target key end

     0   :  { %12 = vsyncpa [#allocation3], 0  ;;  %s653_s0 = inlined_call_operand.hbm [shape: f32[8,32], index: 0, kind: input, shape index: {}]   ;;  %s654_s1 = inlined_call_operand.hbm [shape: bf16[32,128], index: 1, kind: input, shape index: {}]   ;;  %s655_s2 = inlined_call_operand.hbm [shape: f32[1,128], index: 2, kind: input, shape index: {}]   ;;  %s656_s3 = inlined_call_operand.hbm [shape: bf16[128,128], index: 3, kind: input, shape index: {}]   ;;  %s657_s4 = inlined_call_operand.vmem [shape: f32[1,128], index: 4, kind: input, shape index: {}]   ;;  %s658_s5 = inlined_call_operand.hbm [shape: bf16[128,128], index: 5, kind: input, shape index: {}]   ;;  %s659_s6 = inlined_call_operand.vmem [shape: f32[1,128], index: 6, kind: input, shape index: {}]   ;;  %s660_s7 = inlined_call_operand.hbm [shape: f32[8,128], index: 7, kind: output, shape index: {}]  }
   0x1   :  { %13 = vsyncpa [#allocation6], 0 }
   0x2   :  { %14 = vsyncpa [#allocation9], 0  ;;  %s31_s26 = sshll.u32 %s654_s1, 4  ;;  %s32_s26 = int_to_ptr.hbm [resolvable:$true] %s31_s26 }
   0x3   :  { %15 = vsyncpa [#allocation4], 0  ;;  %s581_s27 = smov [#allocation5]   ;;  %s55_s8 = sshll.u32 %s656_s3, 4  ;;  %s56_s8 = int_to_ptr.hbm [resolvable:$true] %s55_s8 }
   0x4   :  { %s33_s28 = sshll.u32 %s581_s27, 4  ;;  %s582_s9 = smov 64   ;;  %s34_s28 = int_to_ptr.vmem [resolvable:$true] %s33_s28 }
   0x5   :  { %s583_s10 = smov 4   ;;  %s584_s11 = smov [#allocation8]  }
   0x6   :  { %39 = dma.hbm_to_vmem [thread:$0]  %s32_s26, 256, %s34_s28, [#allocation6], %s582_s9, %s582_s9, %s583_s10  }
   0x7   :  { %s57_s12 = sshll.u32 %s584_s11, 4  ;;  %s21_s15 = sshll.u32 %s653_s0, 4  ;;  %s58_s12 = int_to_ptr.vmem [resolvable:$true] %s57_s12  ;;  %s22_s15 = int_to_ptr.hbm [resolvable:$true] %s21_s15 }
   0x8   :  { %63 = dma.hbm_to_vmem [thread:$0]  %s56_s8, 1024, %s58_s12, [#allocation9], %s582_s9, %s582_s9, %s583_s10  }
   0x9   :  { %s45_s17 = sshll.u32 %s655_s2, 4  ;;  %s585_s18 = smov [#allocation2]   ;;  %s46_s17 = int_to_ptr.hbm [resolvable:$true] %s45_s17 }
   0xa   :  { %s23_s19 = sshll.u32 %s585_s18, 4  ;;  %s586_s3 = smov [#allocation7]   ;;  %s24_s19 = int_to_ptr.vmem [resolvable:$true] %s23_s19 }
   0xb   :  { %26 = dma.hbm_to_vmem [thread:$0]  %s22_s15, 128, %s24_s19, [#allocation3]  }
   0xc   :  { %s47_s20 = sshll.u32 %s586_s3, 4  ;;  %s70_s23 = sshll.u32 %s658_s5, 4  ;;  %s48_s20 = int_to_ptr.vmem [resolvable:$true] %s47_s20  ;;  %s71_s23 = int_to_ptr.hbm [resolvable:$true] %s70_s23 }
   0xd   :  { %50 = dma.hbm_to_vmem [thread:$0]  %s46_s17, 16, %s48_s20, [#allocation6]  }
   0xe   :  { %s587_s0 = smov [#allocation10]  }
   0xf   :  { %s72_s24 = sshll.u32 %s587_s0, 4  ;;  %s73_s24 = int_to_ptr.vmem [resolvable:$true] %s72_s24 }
  0x10   :  { %78 = dma.hbm_to_vmem [thread:$0]  %s71_s23, 1024, %s73_s24, [#allocation9], %s582_s9, %s582_s9, %s583_s10  }
  0x11   :  { %573 = dma.done.wait [#allocation3], 128  }
  0x12   :  { %574 = vsyncadd [#allocation3], 4294967168 }
  0x13   :  { %575 = dma.done.wait [#allocation6], 272  }
  0x14   :  { %576 = vsyncadd [#allocation6], 4294967024 }
  0x15   :  { %577 = dma.done.wait [#allocation9], 2048  }
  0x16   :  { %578 = vsyncadd [#allocation9], 4294965248  ;;  %v401_v0 = vld [vmem:[#allocation5 + $0x8] sm:$0xff]  ;;  %v400_v2 = vld [vmem:[#allocation5] sm:$0xff]  ;;  %vm124_vm0 = vcmask 261120   ;;  %s588_s27 = smov [#allocation11]  }
  0x17   :  { %v409_v1 = vld [vmem:[#allocation8 + $0x38] sm:$0xff]  ;;  %134 = vmatpush.bf16.msra.mxu0 %v401_v0  ;;  %v102_v3 = vld [vmem:[#allocation2] sm:$0xff]  ;;  %v408_v4 = vld [vmem:[#allocation8 + $0x30] sm:$0xff]  ;;  %s313_s28 = sshll.u32 %s588_s27, 4  ;;  %s315_s8 = sshll.u32 %s660_s7, 4  ;;  %s314_s28 = int_to_ptr.vmem [resolvable:$true] %s313_s28  ;;  %s316_s8 = int_to_ptr.hbm [resolvable:$true] %s315_s8 }
  0x18   :  { %211 = vmatpush.bf16.msra.mxu1 %v409_v1  ;;  %v108_v5 = vpack.c.bf16 %v102_v3, %v102_v3  ;;  %v407_v6 = vld [vmem:[#allocation8 + $0x28] sm:$0xff]  ;;  %v406_v7 = vld [vmem:[#allocation8 + $0x20] sm:$0xff]  ;;  %v405_v8 = vld [vmem:[#allocation8 + $0x18] sm:$0xff] }
  0x19   :  { %v404_v9 = vld [vmem:[#allocation8 + $0x10] sm:$0xff]  ;;  %v403_v10 = vld [vmem:[#allocation8 + $0x8] sm:$0xff]  ;;  %v402_v11 = vld [vmem:[#allocation8] sm:$0xff] }
  0x1a   :  { %v417_v12 = vld [vmem:[#allocation10 + $0x38] sm:$0xff]  ;;  %v416_v13 = vld [vmem:[#allocation10 + $0x30] sm:$0xff]  ;;  %v415_v14 = vld [vmem:[#allocation10 + $0x28] sm:$0xff] }
  0x1b   :  { %135 = vmatpush.bf16.msra.mxu0 %v400_v2  ;;  %294 = vmatpush.bf16.msra.mxu2 %v417_v12  ;;  %v414_v15 = vld [vmem:[#allocation10 + $0x20] sm:$0xff]  ;;  %v413_v16 = vld [vmem:[#allocation10 + $0x18] sm:$0xff]  ;;  %v412_v17 = vld [vmem:[#allocation10 + $0x10] sm:$0xff] }
  0x1c   :  { %212 = vmatpush.bf16.msra.mxu1 %v408_v4  ;;  %v426_v18 = vld [vmem:[#allocation7] ss:$0 sm:$0xff]  ;;  %v411_v24 = vld [vmem:[#allocation10 + $0x8] sm:$0xff]  ;;  %v410_v25 = vld [vmem:[#allocation10] sm:$0xff] }
  0x1d   :  { %v427_v26 = vld [vmem:[%s657_s4] ss:$0 sm:$0xff] }
  0x1e   :  { %335 = vmatmul.msk.bf16.vlgmr.msra.gmra.mxu0 %vm124_vm0, %v108_v5  ;;  %v428_v32 = vld [vmem:[%s659_s6] ss:$0 sm:$0xff] }
  0x1f   :  { %295 = vmatpush.bf16.msra.mxu2 %v416_v13 }
  0x20   :  { %213 = vmatpush.bf16.msra.mxu1 %v407_v6 }
  0x23   :  { %296 = vmatpush.bf16.msra.mxu2 %v415_v14 }
  0x24   :  { %214 = vmatpush.bf16.msra.mxu1 %v406_v7 }
  0x27   :  { %297 = vmatpush.bf16.msra.mxu2 %v414_v15 }
  0x28   :  { %215 = vmatpush.bf16.msra.mxu1 %v405_v8 }
  0x2b   :  { %298 = vmatpush.bf16.msra.mxu2 %v413_v16 }
  0x2c   :  { %216 = vmatpush.bf16.msra.mxu1 %v404_v9 }
  0x2f   :  { %299 = vmatpush.bf16.msra.mxu2 %v412_v17 }
  0x30   :  { %217 = vmatpush.bf16.msra.mxu1 %v403_v10 }
  0x33   :  { %300 = vmatpush.bf16.msra.mxu2 %v411_v24 }
  0x34   :  { %218 = vmatpush.bf16.msra.mxu1 %v402_v11 }
  0x37   :  { %301 = vmatpush.bf16.msra.mxu2 %v410_v25 }
  0x9b   :  { %v137_v19 = vpop.f32.mrf.mxu0 }
  0x9c   :  { %v138_v20 = vadd.f32 %v426_v18, %v137_v19 }
  0x9e   :  { %v141_v21 = vmax.f32 %v138_v20, 0.0 }
  0xa0   :  { %v159_v22 = vpack.c.bf16 %v141_v21, %v141_v21 }
  0xa2   :  { %219 = vmatmul.bf16.vlgmr.msra.gmra.mxu1 %v159_v22 }
  0xa3   :  { %v139_v23 = vpop.f32.mrf.mxu0 }
 0x11f   :  { %v220_v27 = vpop.f32.mrf.mxu1 }
 0x120   :  { %v221_v28 = vadd.f32 %v427_v26, %v220_v27 }
 0x122   :  { %v224_v29 = vmax.f32 %v221_v28, 0.0 }
 0x124   :  { %v242_v30 = vpack.c.bf16 %v224_v29, %v224_v29 }
 0x126   :  { %302 = vmatmul.bf16.vlgmr.msra.gmra.mxu2 %v242_v30 }
 0x127   :  { %v222_v31 = vpop.f32.mrf.mxu1 }
 0x1a9   :  { %v303_v33 = vpop.f32.mrf.mxu2 }
 0x1aa   :  { %v304_v34 = vadd.f32 %v428_v32, %v303_v33 }
 0x1ac   :  { %307 = vst [vmem:[#allocation11] sm:$0xff] %v304_v34 }
 0x1ad   :  { %318 = dma.vmem_to_hbm [thread:$0]  %s314_s28, 128, %s316_s8, [#allocation4]  }
 0x1b1   :  { %v305_v35 = vpop.f32.mrf.mxu2 }
 0x1b2   :  { %579 = dma.done.wait [#allocation4], 128  }
 0x1b3   :  { %580 = vsyncadd [#allocation4], 4294967168 }
 0x1b4   :  { %323 = vsyncpa [#allocation3], 1 }
 0x1b5   :  { %324 = vsyncpa [#allocation6], 1 }
 0x1b6   :  { %325 = vsyncpa [#allocation9], 1 }
 0x1b7   :  { %326 = vsyncpa [#allocation4], 1 }

// kernel: encoder_forward.1
= control target key start
LH: loop header
LB: loop body
LE: loop exit
PB: predicated region body
PF: predicated region fallthrough
CT: control target
= control target key end

     0   :  { %12 = vsyncpa [#allocation3], 0  ;;  %s472_s0 = inlined_call_operand.hbm [shape: f32[8,32], index: 0, kind: input, shape index: {}]   ;;  %s473_s1 = inlined_call_operand.hbm [shape: f32[32,128], index: 1, kind: input, shape index: {}]   ;;  %s474_s2 = inlined_call_operand.hbm [shape: f32[1,128], index: 2, kind: input, shape index: {}]   ;;  %s475_s3 = inlined_call_operand.hbm [shape: f32[128,128], index: 3, kind: input, shape index: {}]   ;;  %s476_s4 = inlined_call_operand.vmem [shape: f32[1,128], index: 4, kind: input, shape index: {}]   ;;  %s477_s5 = inlined_call_operand.hbm [shape: f32[128,128], index: 5, kind: input, shape index: {}]   ;;  %s478_s6 = inlined_call_operand.vmem [shape: f32[1,128], index: 6, kind: input, shape index: {}]   ;;  %s479_s7 = inlined_call_operand.hbm [shape: f32[8,128], index: 7, kind: output, shape index: {}]  }
   0x1   :  { %13 = vsyncpa [#allocation6], 0 }
   0x2   :  { %14 = vsyncpa [#allocation9], 0  ;;  %s31_s26 = sshll.u32 %s473_s1, 4  ;;  %s32_s26 = int_to_ptr.hbm [resolvable:$true] %s31_s26 }
   0x3   :  { %15 = vsyncpa [#allocation4], 0  ;;  %s400_s27 = smov [#allocation5]   ;;  %s55_s8 = sshll.u32 %s475_s3, 4  ;;  %s56_s8 = int_to_ptr.hbm [resolvable:$true] %s55_s8 }
   0x4   :  { %s33_s28 = sshll.u32 %s400_s27, 4  ;;  %s401_s9 = smov 128   ;;  %s34_s28 = int_to_ptr.vmem [resolvable:$true] %s33_s28 }
   0x5   :  { %s402_s10 = smov 8   ;;  %s403_s11 = smov [#allocation8]  }
   0x6   :  { %39 = dma.hbm_to_vmem [thread:$0]  %s32_s26, 512, %s34_s28, [#allocation6], %s401_s9, %s401_s9, %s402_s10  }
   0x7   :  { %s57_s12 = sshll.u32 %s403_s11, 4  ;;  %s21_s15 = sshll.u32 %s472_s0, 4  ;;  %s58_s12 = int_to_ptr.vmem [resolvable:$true] %s57_s12  ;;  %s22_s15 = int_to_ptr.hbm [resolvable:$true] %s21_s15 }
   0x8   :  { %63 = dma.hbm_to_vmem [thread:$0]  %s56_s8, 2048, %s58_s12, [#allocation9], %s401_s9, %s401_s9, %s402_s10  }
   0x9   :  { %s45_s17 = sshll.u32 %s474_s2, 4  ;;  %s404_s18 = smov [#allocation2]   ;;  %s46_s17 = int_to_ptr.hbm [resolvable:$true] %s45_s17 }
   0xa   :  { %s23_s19 = sshll.u32 %s404_s18, 4  ;;  %s405_s3 = smov [#allocation7]   ;;  %s24_s19 = int_to_ptr.vmem [resolvable:$true] %s23_s19 }
   0xb   :  { %26 = dma.hbm_to_vmem [thread:$0]  %s22_s15, 128, %s24_s19, [#allocation3]  }
   0xc   :  { %s47_s20 = sshll.u32 %s405_s3, 4  ;;  %s70_s23 = sshll.u32 %s477_s5, 4  ;;  %s48_s20 = int_to_ptr.vmem [resolvable:$true] %s47_s20  ;;  %s71_s23 = int_to_ptr.hbm [resolvable:$true] %s70_s23 }
   0xd   :  { %50 = dma.hbm_to_vmem [thread:$0]  %s46_s17, 16, %s48_s20, [#allocation6]  }
   0xe   :  { %s406_s0 = smov [#allocation10]  }
   0xf   :  { %s72_s24 = sshll.u32 %s406_s0, 4  ;;  %s73_s24 = int_to_ptr.vmem [resolvable:$true] %s72_s24 }
  0x10   :  { %78 = dma.hbm_to_vmem [thread:$0]  %s71_s23, 2048, %s73_s24, [#allocation9], %s401_s9, %s401_s9, %s402_s10  }
  0x11   :  { %392 = dma.done.wait [#allocation3], 128  }
  0x12   :  { %393 = vsyncadd [#allocation3], 4294967168 }
  0x13   :  { %394 = dma.done.wait [#allocation6], 528  }
  0x14   :  { %395 = vsyncadd [#allocation6], 4294966768 }
  0x15   :  { %396 = dma.done.wait [#allocation9], 4096  }
  0x16   :  { %397 = vsyncadd [#allocation9], 4294963200  ;;  %v105_v0 = vld [vmem:[#allocation5 + $0x18] sm:$0xff]  ;;  %v104_v1 = vld [vmem:[#allocation5 + $0x10] sm:$0xff]  ;;  %vm110_vm0 = vcmask 261120   ;;  %s407_s27 = smov [#allocation11]  }
  0x17   :  { %126 = vmatpush.msra.mxu0 %v105_v0  ;;  %v150_v2 = vld [vmem:[#allocation8 + $0x78] sm:$0xff]  ;;  %v103_v3 = vld [vmem:[#allocation5 + $0x8] sm:$0xff]  ;;  %v149_v4 = vld [vmem:[#allocation8 + $0x70] sm:$0xff]  ;;  %s222_s28 = sshll.u32 %s407_s27, 4  ;;  %s224_s8 = sshll.u32 %s479_s7, 4  ;;  %s223_s28 = int_to_ptr.vmem [resolvable:$true] %s222_s28  ;;  %s225_s8 = int_to_ptr.hbm [resolvable:$true] %s224_s8 }
  0x18   :  { %155 = vmatpush.msra.mxu1 %v150_v2  ;;  %v148_v5 = vld [vmem:[#allocation8 + $0x68] sm:$0xff]  ;;  %v102_v6 = vld [vmem:[#allocation5] sm:$0xff]  ;;  %v101_v7 = vld [vmem:[#allocation2] sm:$0xff] }
  0x19   :  { %127 = vmatpush.msra.mxu0 %v104_v1  ;;  %v147_v8 = vld [vmem:[#allocation8 + $0x60] sm:$0xff]  ;;  %v146_v9 = vld [vmem:[#allocation8 + $0x58] sm:$0xff]  ;;  %v145_v10 = vld [vmem:[#allocation8 + $0x50] sm:$0xff] }
  0x1a   :  { %156 = vmatpush.msra.mxu1 %v149_v4  ;;  %v144_v11 = vld [vmem:[#allocation8 + $0x48] sm:$0xff]  ;;  %v143_v12 = vld [vmem:[#allocation8 + $0x40] sm:$0xff]  ;;  %v142_v13 = vld [vmem:[#allocation8 + $0x38] sm:$0xff] }
  0x1b   :  { %128 = vmatpush.msra.mxu0 %v103_v3  ;;  %v141_v14 = vld [vmem:[#allocation8 + $0x30] sm:$0xff]  ;;  %v140_v15 = vld [vmem:[#allocation8 + $0x28] sm:$0xff]  ;;  %v139_v16 = vld [vmem:[#allocation8 + $0x20] sm:$0xff] }
  0x1c   :  { %157 = vmatpush.msra.mxu1 %v148_v5  ;;  %v138_v17 = vld [vmem:[#allocation8 + $0x18] sm:$0xff]  ;;  %v137_v18 = vld [vmem:[#allocation8 + $0x10] sm:$0xff]  ;;  %v136_v19 = vld [vmem:[#allocation8 + $0x8] sm:$0xff] }
  0x1d   :  { %129 = vmatpush.msra.mxu0 %v102_v6  ;;  %v135_v20 = vld [vmem:[#allocation8] sm:$0xff]  ;;  %v191_v21 = vld [vmem:[#allocation10 + $0x78] sm:$0xff]  ;;  %v190_v22 = vld [vmem:[#allocation10 + $0x70] sm:$0xff] }
  0x1e   :  { %236 = vmatmul.msk.f32.vlgmr.msra.gmra.mxu0 %vm110_vm0, %v101_v7  ;;  %158 = vmatpush.msra.mxu1 %v147_v8  ;;  %v189_v23 = vld [vmem:[#allocation10 + $0x68] sm:$0xff]  ;;  %v188_v24 = vld [vmem:[#allocation10 + $0x60] sm:$0xff]  ;;  %v187_v25 = vld [vmem:[#allocation10 + $0x58] sm:$0xff] }
  0x1f   :  { %196 = vmatpush.msra.mxu2 %v191_v21  ;;  %v186_v26 = vld [vmem:[#allocation10 + $0x50] sm:$0xff]  ;;  %v185_v27 = vld [vmem:[#allocation10 + $0x48] sm:$0xff]  ;;  %v184_v28 = vld [vmem:[#allocation10 + $0x40] sm:$0xff] }
  0x20   :  { %159 = vmatpush.msra.mxu1 %v146_v9  ;;  %v183_v29 = vld [vmem:[#allocation10 + $0x38] sm:$0xff]  ;;  %v182_v30 = vld [vmem:[#allocation10 + $0x30] sm:$0xff]  ;;  %v181_v31 = vld [vmem:[#allocation10 + $0x28] sm:$0xff] }
  0x21   :  { %197 = vmatpush.msra.mxu2 %v190_v22  ;;  %v180_v32 = vld [vmem:[#allocation10 + $0x20] sm:$0xff]  ;;  %v179_v33 = vld [vmem:[#allocation10 + $0x18] sm:$0xff]  ;;  %v178_v38 = vld [vmem:[#allocation10 + $0x10] sm:$0xff] }
  0x22   :  { %160 = vmatpush.msra.mxu1 %v145_v10  ;;  %v245_v34 = vld [vmem:[#allocation7] ss:$0 sm:$0xff]  ;;  %v177_v39 = vld [vmem:[#allocation10 + $0x8] sm:$0xff]  ;;  %v176_v40 = vld [vmem:[#allocation10] sm:$0xff] }
  0x23   :  { %198 = vmatpush.msra.mxu2 %v189_v23  ;;  %v246_v41 = vld [vmem:[%s476_s4] ss:$0 sm:$0xff] }
  0x24   :  { %161 = vmatpush.msra.mxu1 %v144_v11  ;;  %v247_v45 = vld [vmem:[%s478_s6] ss:$0 sm:$0xff] }
  0x25   :  { %199 = vmatpush.msra.mxu2 %v188_v24 }
  0x26   :  { %162 = vmatpush.msra.mxu1 %v143_v12 }
  0x27   :  { %200 = vmatpush.msra.mxu2 %v187_v25 }
  0x28   :  { %163 = vmatpush.msra.mxu1 %v142_v13 }
  0x29   :  { %201 = vmatpush.msra.mxu2 %v186_v26 }
  0x2a   :  { %164 = vmatpush.msra.mxu1 %v141_v14 }
  0x2b   :  { %202 = vmatpush.msra.mxu2 %v185_v27 }
  0x2c   :  { %165 = vmatpush.msra.mxu1 %v140_v15 }
  0x2d   :  { %203 = vmatpush.msra.mxu2 %v184_v28 }
  0x2e   :  { %166 = vmatpush.msra.mxu1 %v139_v16 }
  0x2f   :  { %204 = vmatpush.msra.mxu2 %v183_v29 }
  0x30   :  { %167 = vmatpush.msra.mxu1 %v138_v17 }
  0x31   :  { %205 = vmatpush.msra.mxu2 %v182_v30 }
  0x32   :  { %168 = vmatpush.msra.mxu1 %v137_v18 }
  0x33   :  { %206 = vmatpush.msra.mxu2 %v181_v31 }
  0x34   :  { %169 = vmatpush.msra.mxu1 %v136_v19 }
  0x35   :  { %207 = vmatpush.msra.mxu2 %v180_v32 }
  0x36   :  { %170 = vmatpush.msra.mxu1 %v135_v20 }
  0x37   :  { %208 = vmatpush.msra.mxu2 %v179_v33 }
  0x39   :  { %209 = vmatpush.msra.mxu2 %v178_v38 }
  0x3b   :  { %210 = vmatpush.msra.mxu2 %v177_v39 }
  0x3d   :  { %211 = vmatpush.msra.mxu2 %v176_v40 }
  0x9b   :  { %v131_v35 = vpop.f32.mrf.mxu0 }
  0x9c   :  { %v132_v36 = vadd.f32 %v245_v34, %v131_v35 }
  0x9e   :  { %v134_v37 = vmax.f32 %v132_v36, 0.0 }
  0xa0   :  { %171 = vmatmul.f32.vlgmr.msra.gmra.mxu1 %v134_v37 }
 0x11d   :  { %v172_v42 = vpop.f32.mrf.mxu1 }
 0x11e   :  { %v173_v43 = vadd.f32 %v246_v41, %v172_v42 }
 0x120   :  { %v175_v44 = vmax.f32 %v173_v43, 0.0 }
 0x122   :  { %212 = vmatmul.f32.vlgmr.msra.gmra.mxu2 %v175_v44 }
 0x1a5   :  { %v213_v46 = vpop.f32.mrf.mxu2 }
 0x1a6   :  { %v214_v47 = vadd.f32 %v247_v45, %v213_v46 }
 0x1a8   :  { %216 = vst [vmem:[#allocation11] sm:$0xff] %v214_v47 }
 0x1a9   :  { %227 = dma.vmem_to_hbm [thread:$0]  %s223_s28, 128, %s225_s8, [#allocation4]  }
 0x1aa   :  { %398 = dma.done.wait [#allocation4], 128  }
 0x1ab   :  { %399 = vsyncadd [#allocation4], 4294967168 }
 0x1ac   :  { %232 = vsyncpa [#allocation3], 1 }
 0x1ad   :  { %233 = vsyncpa [#allocation6], 1 }
 0x1ae   :  { %234 = vsyncpa [#allocation9], 1 }
 0x1af   :  { %235 = vsyncpa [#allocation4], 1 }

</bundles_post_ra>
